<compile_context>
chip_gen: v7x
topology: tpu7x:2x2x1
jax: 0.10.0
libtpu: 0.0.40
codegen_flags: <defaults>
</compile_context>

<pallas_src>
import jax
import jax.numpy as jnp
from jax.experimental import pallas as pl
from jax.experimental.pallas import tpu as pltpu


_VMEM_LIMIT = 48 * 1024 * 1024  # cap below v7x's 64 MiB physical VMEM; ok on v5e/v6e


def _sublane(dtype):
    # dtype-aware second-minor alignment: f32 -> 8, bf16 -> 16, int8/fp8 -> 32
    return {4: 8, 2: 16, 1: 32}[jnp.dtype(dtype).itemsize]


def _pick_tile(dim, pref, align):
    """Largest tile <= pref that divides dim and respects alignment; falling back
    to the full dimension (block == full array dim) is always legal."""
    if dim <= pref:
        return dim
    t = (pref // align) * align
    while t >= align:
        if dim % t == 0:
            return t
        t -= align
    return dim


# ----------------------------------------------------------------------------
# fused tiled matmul + bias:  (M, K) @ (K, N) + (1, N) -> (M, N)
# bf16 operands on the MXU, f32 accumulator scratch, f32 bias in the epilogue.
# ----------------------------------------------------------------------------
def _matmul_bias_kernel(x_ref, w_ref, b_ref, o_ref, acc_ref):
    k = pl.program_id(2)

    @pl.when(k == 0)
    def _():
        acc_ref[...] = jnp.zeros_like(acc_ref)

    acc_ref[...] += jnp.dot(x_ref[...], w_ref[...],
                            preferred_element_type=jnp.float32)

    @pl.when(k == pl.num_programs(2) - 1)
    def _():
        o_ref[...] = (acc_ref[...] + b_ref[...]).astype(o_ref.dtype)


def matmul_bias_pallas(x, w, b, *, out_dtype, tm=256, tn=512, tk=512):
    M, K = x.shape
    _, N = w.shape
    tm = _pick_tile(M, tm, _sublane(x.dtype))
    tn = _pick_tile(N, tn, 128)
    tk = _pick_tile(K, tk, 128)
    grid = (M // tm, N // tn, K // tk)
    return pl.pallas_call(
        _matmul_bias_kernel,
        out_shape=jax.ShapeDtypeStruct((M, N), out_dtype),
        grid_spec=pltpu.PrefetchScalarGridSpec(
            num_scalar_prefetch=0,
            grid=grid,
            in_specs=[
                pl.BlockSpec((tm, tk), lambda i, j, k: (i, k)),
                pl.BlockSpec((tk, tn), lambda i, j, k: (k, j)),
                pl.BlockSpec((1, tn), lambda i, j, k: (0, j)),
            ],
            out_specs=pl.BlockSpec((tm, tn), lambda i, j, k: (i, j)),
            scratch_shapes=[pltpu.VMEM((tm, tn), jnp.float32)],
        ),
        compiler_params=pltpu.CompilerParams(
            dimension_semantics=("parallel", "parallel", "arbitrary"),
            vmem_limit_bytes=_VMEM_LIMIT),
    )(x, w, b)


# ----------------------------------------------------------------------------
# flash attention (online softmax, non-causal) with RoPE fused into q/k loads.
# Inputs arrive as one (3, B*H, T, hs) slab [q | k | v]; q is pre-scaled by
# 1/sqrt(hs) and q/k channels are pre-de-interleaved, so RoPE is a rotate-half.
# ----------------------------------------------------------------------------
def _mla_attn_kernel(q_ref, k_ref, v_ref, cq_ref, sq_ref, ck_ref, sk_ref,
                     o_ref, m_sc, l_sc, acc_sc):
    ki = pl.program_id(2)
    half = q_ref.shape[-1] // 2

    @pl.when(ki == 0)
    def _():
        m_sc[...] = jnp.full(m_sc.shape, -jnp.inf, jnp.float32)
        l_sc[...] = jnp.zeros_like(l_sc)
        acc_sc[...] = jnp.zeros_like(acc_sc)

    def rope(t, c, s):
        # rotate-half RoPE (cos duplicated, sin sign-split in prepare_params).
        # (pltpu.roll(t, half, axis=-1) is the XLU-slot variant for lane-wide hs)
        t = t.astype(jnp.float32)
        rot = jnp.concatenate([t[:, half:], t[:, :half]], axis=-1)
        return (t * c + rot * s).astype(jnp.bfloat16)

    q = rope(q_ref[0, 0], cq_ref[...], sq_ref[...])      # (tq,  hs) bf16
    k = rope(k_ref[0, 0], ck_ref[...], sk_ref[...])      # (tkv, hs) bf16
    v = v_ref[0, 0]                                      # (tkv, hs) bf16

    # scores on the MXU; 1/sqrt(hs) already folded into the q projection
    s = jax.lax.dot_general(q, k, (((1,), (1,)), ((), ())),
                            preferred_element_type=jnp.float32)   # (tq, tkv)
    m_prev = m_sc[...]
    m_new = jnp.maximum(m_prev, s.max(axis=-1, keepdims=True))
    alpha = jnp.exp(m_prev - m_new)
    p = jnp.exp(s - m_new)
    l_sc[...] = alpha * l_sc[...] + p.sum(axis=-1, keepdims=True)
    acc_sc[...] = alpha * acc_sc[...] + jnp.dot(
        p.astype(jnp.bfloat16), v, preferred_element_type=jnp.float32)
    m_sc[...] = m_new

    @pl.when(ki == pl.num_programs(2) - 1)
    def _():
        o_ref[0] = (acc_sc[...] * pl.reciprocal(l_sc[...], approx=True)
                    ).astype(o_ref.dtype)


def mla_attention_pallas(qkv_t, cos, sin, *, tq=128, tkv=512):
    _, BH, T, hs = qkv_t.shape
    tq = _pick_tile(T, tq, _sublane(qkv_t.dtype))
    tkv = _pick_tile(T, tkv, _sublane(qkv_t.dtype))
    grid = (BH, T // tq, T // tkv)
    return pl.pallas_call(
        _mla_attn_kernel,
        out_shape=jax.ShapeDtypeStruct((BH, T, hs), qkv_t.dtype),
        grid_spec=pltpu.PrefetchScalarGridSpec(
            num_scalar_prefetch=0,
            grid=grid,
            in_specs=[
                pl.BlockSpec((1, 1, tq, hs), lambda b, qi, ki: (0, b, qi, 0)),
                pl.BlockSpec((1, 1, tkv, hs), lambda b, qi, ki: (1, b, ki, 0)),
                pl.BlockSpec((1, 1, tkv, hs), lambda b, qi, ki: (2, b, ki, 0)),
                pl.BlockSpec((tq, hs), lambda b, qi, ki: (qi, 0)),
                pl.BlockSpec((tq, hs), lambda b, qi, ki: (qi, 0)),
                pl.BlockSpec((tkv, hs), lambda b, qi, ki: (ki, 0)),
                pl.BlockSpec((tkv, hs), lambda b, qi, ki: (ki, 0)),
            ],
            out_specs=pl.BlockSpec((1, tq, hs), lambda b, qi, ki: (b, qi, 0)),
            scratch_shapes=[
                pltpu.VMEM((tq, 1), jnp.float32),
                pltpu.VMEM((tq, 1), jnp.float32),
                pltpu.VMEM((tq, hs), jnp.float32),
            ],
        ),
        compiler_params=pltpu.CompilerParams(
            dimension_semantics=("parallel", "parallel", "arbitrary"),
            vmem_limit_bytes=_VMEM_LIMIT),
    )(qkv_t, qkv_t, qkv_t, cos, sin, cos, sin)


# ----------------------------------------------------------------------------
# output projection consuming attention output directly in (B*H, T, hs) layout:
# the head axis is the innermost ("arbitrary") reduction grid axis, so the
# usual "concat heads" transpose never materializes in HBM.
# ----------------------------------------------------------------------------
def _head_out_proj_kernel(att_ref, w_ref, b_ref, o_ref, acc_ref):
    h = pl.program_id(3)

    @pl.when(h == 0)
    def _():
        acc_ref[...] = jnp.zeros_like(acc_ref)

    acc_ref[...] += jnp.dot(att_ref[0], w_ref[0],
                            preferred_element_type=jnp.float32)

    @pl.when(h == pl.num_programs(3) - 1)
    def _():
        o_ref[0] = (acc_ref[...] + b_ref[...]).astype(o_ref.dtype)


def head_out_proj_pallas(att, w, b, *, batch, out_dtype, tm=256, tn=512):
    BH, T, hs = att.shape
    H, _, C = w.shape
    B = batch
    assert BH == B * H
    tm = _pick_tile(T, tm, _sublane(att.dtype))
    tn = _pick_tile(C, tn, 128)
    grid = (B, T // tm, C // tn, H)
    return pl.pallas_call(
        _head_out_proj_kernel,
        out_shape=jax.ShapeDtypeStruct((B, T, C), out_dtype),
        grid_spec=pltpu.PrefetchScalarGridSpec(
            num_scalar_prefetch=0,
            grid=grid,
            in_specs=[
                pl.BlockSpec((1, tm, hs), lambda b, ti, j, h: (b * H + h, ti, 0)),
                pl.BlockSpec((1, hs, tn), lambda b, ti, j, h: (h, 0, j)),
                pl.BlockSpec((1, tn), lambda b, ti, j, h: (0, j)),
            ],
            out_specs=pl.BlockSpec((1, tm, tn), lambda b, ti, j, h: (b, ti, j)),
            scratch_shapes=[pltpu.VMEM((tm, tn), jnp.float32)],
        ),
        compiler_params=pltpu.CompilerParams(
            dimension_semantics=("parallel", "parallel", "parallel", "arbitrary"),
            vmem_limit_bytes=_VMEM_LIMIT),
    )(att, w, b)


# ----------------------------------------------------------------------------
# parameters (PyTorch layout) + one-time preparation for the kernels
# ----------------------------------------------------------------------------
def init_mla_params(key, d_model, n_head, block_size, latent_dim):
    head_size = d_model // n_head
    ks = jax.random.split(key, 8)
    raw = dict(
        wq=jax.random.normal(ks[0], (n_head, head_size, d_model), jnp.float32) / jnp.sqrt(d_model),
        bq=jax.random.normal(ks[1], (n_head, head_size), jnp.float32) * 0.01,
        wak=jax.random.normal(ks[2], (n_head, latent_dim, d_model), jnp.float32) / jnp.sqrt(d_model),
        wbk=jax.random.normal(ks[3], (n_head, head_size, latent_dim), jnp.float32) / jnp.sqrt(latent_dim),
        wav=jax.random.normal(ks[4], (n_head, latent_dim, d_model), jnp.float32) / jnp.sqrt(d_model),
        wbv=jax.random.normal(ks[5], (n_head, head_size, latent_dim), jnp.float32) / jnp.sqrt(latent_dim),
        wproj=jax.random.normal(ks[6], (d_model, n_head * head_size), jnp.float32) / jnp.sqrt(d_model),
        bproj=jax.random.normal(ks[7], (d_model,), jnp.float32) * 0.01,
    )
    # RoPE buffers (same construction as the PyTorch module)
    inv_freq = 1.0 / (10000.0 ** (jnp.arange(0, head_size, 2, dtype=jnp.float32) / head_size))
    position = jnp.arange(block_size, dtype=jnp.float32)
    sinusoidal = jnp.einsum('i,j->ij', position, inv_freq)
    raw['cos'] = jnp.cos(sinusoidal)
    raw['sin'] = jnp.sin(sinusoidal)
    return raw


def prepare_params(raw, d_model, n_head, head_size):
    """One-time weight prep (NOT per forward call)."""
    H, hs = n_head, head_size
    scale = 1.0 / (hs ** 0.5)
    # compose the low-rank latent projections once (f32, exact reassociation)
    wk_eff = jnp.einsum('hok,hkd->hod', raw['wbk'], raw['wak'])        # (H, hs, d_model)
    wv_eff = jnp.einsum('hok,hkd->hod', raw['wbv'], raw['wav'])
    # de-interleave q/k channels so in-kernel RoPE is a rotate-half; fold softmax scale into q
    perm = jnp.concatenate([jnp.arange(0, hs, 2), jnp.arange(1, hs, 2)])
    wq_p = raw['wq'][:, perm, :] * scale
    bq_p = raw['bq'][:, perm] * scale
    wk_p = wk_eff[:, perm, :]
    # fused head-major input weight: columns = [q (H*hs) | k (H*hs) | v (H*hs)]
    w_in = jnp.concatenate([wq_p.reshape(H * hs, d_model),
                            wk_p.reshape(H * hs, d_model),
                            wv_eff.reshape(H * hs, d_model)], axis=0).T   # (d_model, 3*H*hs)
    b_in = jnp.concatenate([bq_p.reshape(H * hs),
                            jnp.zeros((2 * H * hs,), jnp.float32)]).reshape(1, -1)
    # RoPE tables in rotate-half form
    cos_full = jnp.concatenate([raw['cos'], raw['cos']], axis=-1)         # (block, hs)
    sin_signed = jnp.concatenate([-raw['sin'], raw['sin']], axis=-1)      # (block, hs)
    w_out = raw['wproj'].T.reshape(H, hs, d_model)                        # (H, hs, d_model)
    b_out = raw['bproj'].reshape(1, -1)
    return dict(w_in=w_in.astype(jnp.bfloat16), b_in=b_in,
                w_out=w_out.astype(jnp.bfloat16), b_out=b_out,
                cos=cos_full, sin=sin_signed)


# ----------------------------------------------------------------------------
# full MultiHeadLatentAttention forward
# ----------------------------------------------------------------------------
def mla_forward(x, prep, *, n_head, head_size):
    B, T, C = x.shape
    H, hs = n_head, head_size
    M = B * T
    x2d = x.reshape(M, C).astype(jnp.bfloat16)

    # 1) single fused projection -> (M, 3*H*hs) bf16 slab [q | k | v]
    qkv = matmul_bias_pallas(x2d, prep['w_in'], prep['b_in'], out_dtype=jnp.bfloat16)

    # 2) one relayout so attention can block per (batch, head).
    # TODO(synk): for head_size % 128 == 0 this transpose can be folded into the
    # attention BlockSpecs (per-head lane blocks) and removed entirely.
    qkv_t = qkv.reshape(B, T, 3, H, hs).transpose(2, 0, 3, 1, 4).reshape(3, B * H, T, hs)

    # 3) flash attention with fused rotate-half RoPE (non-causal, like the reference).
    att = mla_attention_pallas(qkv_t, prep['cos'][:T], prep['sin'][:T])   # (B*H, T, hs)

    # 4) output projection over (head, hs); no "concat heads" transpose in HBM.
    # TODO(synk): dropout (attention probs + output) omitted: eval semantics.
    return head_out_proj_pallas(att, prep['w_out'], prep['b_out'],
                                batch=B, out_dtype=x.dtype)               # (B, T, C)


# ----------------------------------------------------------------------------
# pure-JAX reference (direct transcription of the PyTorch module)
# ----------------------------------------------------------------------------
def mla_reference(x, raw, *, n_head, head_size):
    B, T, C = x.shape
    cos = raw['cos'][:T][None]
    sin = raw['sin'][:T][None]
    outs = []
    for h in range(n_head):
        q = x @ raw['wq'][h].T + raw['bq'][h]
        k = (x @ raw['wak'][h].T) @ raw['wbk'][h].T
        v = (x @ raw['wav'][h].T) @ raw['wbv'][h].T
        q1, q2 = q[..., ::2], q[..., 1::2]
        k1, k2 = k[..., ::2], k[..., 1::2]
        q = jnp.concatenate([q1 * cos - q2 * sin, q1 * sin + q2 * cos], axis=-1)
        k = jnp.concatenate([k1 * cos - k2 * sin, k1 * sin + k2 * cos], axis=-1)
        s = q @ jnp.swapaxes(k, -1, -2) / (head_size ** 0.5)
        a = jax.nn.softmax(s, axis=-1)
        outs.append(a @ v)
    out = jnp.concatenate(outs, axis=-1)
    return out @ raw['wproj'].T + raw['bproj']


if __name__ == "__main__":
    key = jax.random.PRNGKey(0)
    batch, seq = 2, 8
    d_model, n_head, block_size = 32, 4, 16
    head_size = d_model // n_head                 # 8
    latent_dim = max(1, head_size // 2)           # 4

    kx, kp = jax.random.split(key)
    x = jax.random.normal(kx, (batch, seq, d_model), dtype=jnp.float32)
    raw = init_mla_params(kp, d_model, n_head, block_size, latent_dim)
    prep = prepare_params(raw, d_model, n_head, head_size)

    out = mla_forward(x, prep, n_head=n_head, head_size=head_size)
    out = jax.block_until_ready(out)

    ref = mla_reference(x, raw, n_head=n_head, head_size=head_size)
    assert out.shape == (batch, seq, d_model)
    max_err = float(jnp.max(jnp.abs(out - ref)))
    # bf16 matmul path -> slightly looser tolerance than pure f32
    assert jnp.allclose(out, ref, atol=3e-2, rtol=3e-2), f"max abs err {max_err}"

    print("KERNEL_OK")
</pallas_src>

<mosaic_0001>
module attributes {stable_mosaic.version = 11 : i64} {
  func.func @_matmul_bias_kernel(%arg0: i32, %arg1: i32, %arg2: i32, %arg3: memref<16x32xbf16, #tpu.memory_space<vmem>>, %arg4: memref<32x96xbf16, #tpu.memory_space<vmem>>, %arg5: memref<1x96xf32, #tpu.memory_space<vmem>>, %arg6: memref<16x96xbf16, #tpu.memory_space<vmem>>, %arg7: memref<16x96xf32, #tpu.memory_space<vmem>>) attributes {dimension_semantics = [#tpu.dimension_semantics<parallel>, #tpu.dimension_semantics<parallel>, #tpu.dimension_semantics<arbitrary>], iteration_bounds = array<i64: 1, 1, 1>, scalar_prefetch = 0 : i64, scratch_operands = 1 : i64, tpu.core_type = #tpu.core_type<tc>, window_params = [{transform_indices = @transform_0, window_bounds = array<i64: 16, 32>}, {transform_indices = @transform_1, window_bounds = array<i64: 32, 96>}, {transform_indices = @transform_2, window_bounds = array<i64: 1, 96>}, {transform_indices = @transform_3, window_bounds = array<i64: 16, 96>}]} {
    %c0_i32 = arith.constant 0 : i32
    %0 = arith.cmpi eq, %arg2, %c0_i32 : i32
    %1 = arith.extui %0 : i1 to i32
    %c0_i32_0 = arith.constant 0 : i32
    %2 = arith.cmpi ne, %1, %c0_i32_0 : i32
    scf.if %2 {
      %cst_10 = arith.constant 0.000000e+00 : f32
      %12 = vector.broadcast %cst_10 : f32 to vector<16x96xf32>
      %c0_11 = arith.constant 0 : index
      %c0_12 = arith.constant 0 : index
      %13 = vector.load %arg7[%c0_11, %c0_12] : memref<16x96xf32, #tpu.memory_space<vmem>>, vector<16x96xf32>
      tpu.vector_store %arg7[%c0_11, %c0_12], %12 {strides = array<i32>} : memref<16x96xf32, #tpu.memory_space<vmem>>, vector<16x96xf32>,
    } else {
    }
    %c0 = arith.constant 0 : index
    %c0_1 = arith.constant 0 : index
    %3 = vector.load %arg7[%c0, %c0_1] : memref<16x96xf32, #tpu.memory_space<vmem>>, vector<16x96xf32>
    %c0_2 = arith.constant 0 : index
    %c0_3 = arith.constant 0 : index
    %4 = vector.load %arg3[%c0_2, %c0_3] : memref<16x32xbf16, #tpu.memory_space<vmem>>, vector<16x32xbf16>
    %c0_4 = arith.constant 0 : index
    %c0_5 = arith.constant 0 : index
    %5 = vector.load %arg4[%c0_4, %c0_5] : memref<32x96xbf16, #tpu.memory_space<vmem>>, vector<32x96xbf16>
    %cst = arith.constant dense<0.000000e+00> : vector<16x96xf32>
    %6 = tpu.matmul %4, %5, %cst {dimension_numbers = #tpu.dot_dimension_numbers<[1], [0], [0], [1], [0, 0, 1, 1], [], []>} : vector<16x32xbf16>, vector<32x96xbf16>, vector<16x96xf32> -> vector<16x96xf32>
    %7 = arith.addf %3, %6 : vector<16x96xf32>
    %c0_6 = arith.constant 0 : index
    %c0_7 = arith.constant 0 : index
    %8 = vector.load %arg7[%c0_6, %c0_7] : memref<16x96xf32, #tpu.memory_space<vmem>>, vector<16x96xf32>
    tpu.vector_store %arg7[%c0_6, %c0_7], %7 {strides = array<i32>} : memref<16x96xf32, #tpu.memory_space<vmem>>, vector<16x96xf32>,
    %c0_i32_8 = arith.constant 0 : i32
    %9 = arith.cmpi eq, %arg2, %c0_i32_8 : i32
    %10 = arith.extui %9 : i1 to i32
    %c0_i32_9 = arith.constant 0 : i32
    %11 = arith.cmpi ne, %10, %c0_i32_9 : i32
    scf.if %11 {
      %c0_10 = arith.constant 0 : index
      %c0_11 = arith.constant 0 : index
      %12 = vector.load %arg7[%c0_10, %c0_11] : memref<16x96xf32, #tpu.memory_space<vmem>>, vector<16x96xf32>
      %c0_12 = arith.constant 0 : index
      %c0_13 = arith.constant 0 : index
      %13 = vector.load %arg5[%c0_12, %c0_13] : memref<1x96xf32, #tpu.memory_space<vmem>>, vector<1x96xf32>
      %14 = vector.broadcast %13 : vector<1x96xf32> to vector<16x96xf32>
      %15 = arith.addf %12, %14 : vector<16x96xf32>
      %16 = arith.truncf %15 : vector<16x96xf32> to vector<16x96xbf16>
      %c0_14 = arith.constant 0 : index
      %c0_15 = arith.constant 0 : index
      %17 = vector.load %arg6[%c0_14, %c0_15] : memref<16x96xbf16, #tpu.memory_space<vmem>>, vector<16x96xbf16>
      tpu.vector_store %arg6[%c0_14, %c0_15], %16 {strides = array<i32>} : memref<16x96xbf16, #tpu.memory_space<vmem>>, vector<16x96xbf16>,
    } else {
    }
    return
  }
  func.func @transform_0(%arg0: i32, %arg1: i32, %arg2: i32) -> (i32, i32) {
    %c0_i32 = arith.constant 0 : i32
    return %arg0, %arg2 : i32, i32
  }
  func.func @transform_1(%arg0: i32, %arg1: i32, %arg2: i32) -> (i32, i32) {
    %c0_i32 = arith.constant 0 : i32
    return %arg2, %arg1 : i32, i32
  }
  func.func @transform_2(%arg0: i32, %arg1: i32, %arg2: i32) -> (i32, i32) {
    %c0_i32 = arith.constant 0 : i32
    %c0_i32_0 = arith.constant 0 : i32
    return %c0_i32, %arg1 : i32, i32
  }
  func.func @transform_3(%arg0: i32, %arg1: i32, %arg2: i32) -> (i32, i32) {
    %c0_i32 = arith.constant 0 : i32
    return %arg0, %arg1 : i32, i32
  }
}

</mosaic_0001>

<bundles_post_ra>
// kernel: tpu_custom_call.1
= control target key start
LH: loop header
LB: loop body
LE: loop exit
PB: predicated region body
PF: predicated region fallthrough
CT: control target
= control target key end

     0   :  { %8 = vsyncpa [#allocation4], 0  ;;  %s350_s0 = inlined_call_operand.hbm [shape: bf16[16,32], index: 0, kind: input, shape index: {}]   ;;  %s351_s1 = inlined_call_operand.hbm [shape: bf16[32,96], index: 1, kind: input, shape index: {}]   ;;  %s352_s2 = inlined_call_operand.vmem [shape: f32[1,96], index: 2, kind: input, shape index: {}]   ;;  %s353_s3 = inlined_call_operand.hbm [shape: bf16[16,96], index: 3, kind: output, shape index: {}]  }
   0x1   :  { %9 = vsyncpa [#allocation7], 0 }
   0x2   :  { %10 = vsyncpa [#allocation5], 0  ;;  %s271_s12 = smov [#allocation3]   ;;  %s199_s16 = scalar_lea.hbm %s350_s0, 128 }
   0x3   :  { %s16_s13 = sshll.u32 %s271_s12, 4  ;;  %p200_p0 = scmp.ne.s32.totalorder %s350_s0, %s199_s16  ;;  %s17_s13 = int_to_ptr.vmem [resolvable:$true] %s16_s13 }
   0x4   :  { %p203_p1 = scmp.lt.u32.totalorder %s199_s16, %s350_s0 }
   0x6   :  { %p205_p2 = pnand %p203_p1, %p200_p0 }
   0x8   :  { %208 = shalt.err (!%p205_p2)
}
   0x9   :  { %s209_s21 = scalar_lea.vmem %s17_s13, 128  ;;  %p214_p4 = scmp.lt.s32.totalorder %s17_s13, %s17_s13 }
   0xa   :  { %p210_p3 = scmp.ne.s32.totalorder %s17_s13, %s209_s21  ;;  %p215_p5 = scmp.lt.s32.totalorder %s209_s21, %s209_s21 }
   0xc   :  { %p216_p6 = por %p215_p5, %p214_p4 }
   0xe   :  { %p217_p7 = pnand %p216_p6, %p210_p3 }
  0x10   :  { %220 = shalt.err (!%p217_p7)
}
  0x11   :  { %s272_s22 = smov 64   ;;  %s273_s23 = smov 4  }
  0x12   :  { %22 = dma.hbm_to_vmem [thread:$0]  %s350_s0, 128, %s17_s13, [#allocation4], %s272_s22, %s272_s22, %s273_s23  }
  0x13   :  { %s274_s26 = smov [#allocation6]   ;;  %s221_s30 = scalar_lea.hbm %s351_s1, 256 }
  0x14   :  { %s28_s27 = sshll.u32 %s274_s26, 4  ;;  %p222_p8 = scmp.ne.s32.totalorder %s351_s1, %s221_s30  ;;  %s29_s27 = int_to_ptr.vmem [resolvable:$true] %s28_s27 }
  0x15   :  { %p225_p9 = scmp.lt.u32.totalorder %s221_s30, %s351_s1 }
  0x17   :  { %p227_p10 = pnand %p225_p9, %p222_p8 }
  0x19   :  { %230 = shalt.err (!%p227_p10)
}
  0x1a   :  { %s231_s8 = scalar_lea.vmem %s29_s27, 256  ;;  %p236_p12 = scmp.lt.s32.totalorder %s29_s27, %s29_s27 }
  0x1b   :  { %p232_p11 = scmp.ne.s32.totalorder %s29_s27, %s231_s8  ;;  %p237_p13 = scmp.lt.s32.totalorder %s231_s8, %s231_s8 }
  0x1d   :  { %p238_p0 = por %p237_p13, %p236_p12 }
  0x1f   :  { %p239_p1 = pnand %p238_p0, %p232_p11 }
  0x21   :  { %242 = shalt.err (!%p239_p1)
}
  0x22   :  { %34 = dma.hbm_to_vmem [thread:$0]  %s351_s1, 256, %s29_s27, [#allocation7], %s272_s22, %s272_s22, %s273_s23  }
  0x23   :  { %265 = dma.done.wait [#allocation4], 128  }
  0x24   :  { %266 = vsyncadd [#allocation4], 4294967168 }
  0x25   :  { %267 = dma.done.wait [#allocation7], 256  }
  0x26   :  { %268 = vsyncadd [#allocation7], 4294967040  ;;  %vm48_vm0 = vcmask 785408   ;;  %v275_v0 = vmov 0.0   ;;  %vm276_vm1 = vmmov 0   ;;  %v196_v1 = vld [vmem:[#allocation6] sm:$0xff]  }
  0x27   :  { %49 = vst.msk [vmem:[#allocation2] sm:$0xff] %vm48_vm0, %v275_v0  ;;  %50 = vst.msk [vmem:[#allocation2 + $0x8] sm:$0xff] %vm48_vm0, %v275_v0  ;;  %181 = vmatprep.subr.bf16.mxu0 %v275_v0  ;;  %185 = vmatprep.mubr.msk.bf16.mxu0 %vm276_vm1, %v275_v0  ;;  %v197_v2 = vld [vmem:[#allocation6 + $0x8] sm:$0xff]   ;;  %v198_v3 = vld [vmem:[#allocation3] sm:$0xff]   ;;  %vm76_vm2 = vcmask 261120   ;;  %vm148_vm3 = vcmask 781312  }
  0x28   :  { %182 = vmatpush3.bf16.msra.mxu0 %v196_v1  ;;  %v173_v12 = vld [vmem:[%s352_s2] ss:$0 sm:$0xff]  ;;  %s277_s11 = smov [#allocation8]  }
  0x29   :  { %183 = vmatprep.subr.bf16.mxu0 %v275_v0  ;;  %s156_s12 = sshll.u32 %s277_s11, 4  ;;  %s157_s12 = int_to_ptr.vmem [resolvable:$true] %s156_s12 }
  0x2a   :  { %s243_s13 = scalar_lea.vmem %s157_s12, 128  ;;  %p248_p3 = scmp.lt.s32.totalorder %s157_s12, %s157_s12 }
  0x2b   :  { %p244_p2 = scmp.ne.s32.totalorder %s157_s12, %s243_s13  ;;  %p249_p4 = scmp.lt.s32.totalorder %s243_s13, %s243_s13 }
  0x2c   :  { %184 = vmatpush3.bf16.msra.mxu0 %v197_v2 }
  0x2d   :  { %p250_p5 = por %p249_p4, %p248_p3 }
  0x2e   :  { %v51_v4 = vld [vmem:[#allocation2] sm:$0xff]  ;;  %v52_v6 = vld [vmem:[#allocation2 + $0x8] sm:$0xff] }
  0x2f   :  { %186 = vmatmul.mubr.msk.bf16.vlgmr.msra.gmra.mrb[0].mxu0 %vm76_vm2, %v198_v3  ;;  %p251_p6 = pnand %p250_p5, %p244_p2 }
 0x102   :  { %v114_v5 = vpop.f32.mrb[0].mxu0 }
 0x103   :  { %v121_v7 = vadd.f32 %v114_v5, %v51_v4  ;;  %v187_v8 = vpop.f32.mrb[1].mxu0 }
 0x104   :  { %v117_v9 = vpop.f32.mrb[2].mxu0 }
 0x105   :  { %124 = vst.msk [vmem:[#allocation2] sm:$0xff] %vm48_vm0, %v121_v7  ;;  %v122_v10 = vadd.f32 %v117_v9, %v52_v6  ;;  %v188_v11 = vpop.f32.mrb[3].mxu0 }
 0x107   :  { %125 = vst.msk [vmem:[#allocation2 + $0x8] sm:$0xff] %vm48_vm0, %v122_v10 }
 0x10c   :  { %v129_v13 = vld [vmem:[#allocation2] sm:$0xff] }
 0x10d   :  { %v138_v14 = vadd.f32 %v173_v12, %v129_v13 }
 0x10e   :  { %v130_v15 = vld [vmem:[#allocation2 + $0x8] sm:$0xff] }
 0x10f   :  { %v139_v16 = vadd.f32 %v173_v12, %v130_v15  ;;  %v176_v17 = vpack.c.bf16 %v138_v14, %v138_v14 }
 0x111   :  { %v177_v18 = vpack.c.bf16 %v139_v16, %v139_v16  ;;  %149 = vst.msk [vmem:[#allocation8] sm:$0xf] %vm148_vm3, %v176_v17 }
 0x113   :  { %150 = vst.msk [vmem:[#allocation8 + $0x4] sm:$0xf] %vm148_vm3, %v177_v18 }
 0x114   :  { %254 = shalt.err (!%p251_p6)
}
 0x115   :  { %s255_s15 = scalar_lea.hbm %s353_s3, 128 }
 0x116   :  { %p256_p7 = scmp.ne.s32.totalorder %s353_s3, %s255_s15  ;;  %p259_p8 = scmp.lt.u32.totalorder %s255_s15, %s353_s3 }
 0x118   :  { %p261_p9 = pnand %p259_p8, %p256_p7 }
 0x11a   :  { %264 = shalt.err (!%p261_p9)
}
 0x11b   :  { %162 = dma.vmem_to_hbm [thread:$0]  %s157_s12, 128, %s353_s3, [#allocation5], %s272_s22, %s272_s22, %s273_s23  }
 0x11c   :  { %269 = dma.done.wait [#allocation5], 128  }
 0x11d   :  { %270 = vsyncadd [#allocation5], 4294967168 }
 0x11e   :  { %166 = vsyncpa [#allocation4], 1 }
 0x11f   :  { %167 = vsyncpa [#allocation7], 1 }
 0x120   :  { %168 = vsyncpa [#allocation5], 1 }

</bundles_post_ra>
